<compile_context>
chip_gen: v5e
topology: v5e:2x2
jax: 0.10.0
libtpu: 0.0.40
codegen_flags: <defaults>
</compile_context>

<pallas_src>
import functools

import jax
import jax.numpy as jnp
import numpy as np
from jax.experimental import pallas as pl
from jax.experimental.pallas import tpu as pltpu


# ---------------------------------------------------------------------------
# Kernel
# ---------------------------------------------------------------------------
def _conv3x3_bn_relu(t, a_ref, b_ref):
    """One folded Conv(3x3, s=1, p=1) + BN + ReLU on a (H, W*Cin) f32 matrix.

    t     : (H, W*Cin)          float32 activation (W fused with channels)
    a_ref : (3, W*Cin, W*Cout)  bfloat16 banded weights (one slab per ky)
    b_ref : (1, W*Cout)         float32 folded bias, tiled along W
    """
    zero_row = jnp.zeros_like(t[:1])
    t_up = jnp.concatenate([zero_row, t[:-1]], axis=0)  # row h holds t[h-1]  (ky = 0)
    t_dn = jnp.concatenate([t[1:], zero_row], axis=0)   # row h holds t[h+1]  (ky = 2)

    acc = jnp.dot(t_up.astype(jnp.bfloat16), a_ref[0],
                  preferred_element_type=jnp.float32)
    acc = acc + jnp.dot(t.astype(jnp.bfloat16), a_ref[1],
                        preferred_element_type=jnp.float32)
    acc = acc + jnp.dot(t_dn.astype(jnp.bfloat16), a_ref[2],
                        preferred_element_type=jnp.float32)
    return jnp.maximum(acc + b_ref[...], 0.0)


def _bottleneck_kernel(x_ref, a1_ref, b1_ref, a2_ref, b2_ref, out_ref, *, shortcut):
    """Fused Bottleneck for one image: conv1+BN+ReLU -> conv2+BN+ReLU -> (+x)."""
    x = x_ref[0]                                    # (H, W*C1) float32, unpadded
    y1 = _conv3x3_bn_relu(x, a1_ref, b1_ref)        # (H, W*Cm) float32
    y2 = _conv3x3_bn_relu(y1, a2_ref, b2_ref)       # (H, W*C2) float32
    out = (x + y2) if shortcut else y2
    out_ref[0] = out.astype(out_ref.dtype)


# ---------------------------------------------------------------------------
# Parameter glue: fold the 3x3 conv into per-ky banded matmul weights
# ---------------------------------------------------------------------------
def _band_weights(w_hwio, width):
    """(3, 3, Cin, Cout) HWIO weight -> (3, width*Cin, width*Cout).

    A[ky, wi*Cin+ci, wo*Cout+co] = w[ky, wi-wo+1, ci, co]  if |wi-wo| <= 1 else 0
    The zero bands implement the width-direction zero padding exactly.
    """
    kh, kw, cin, cout = w_hwio.shape
    sel = np.zeros((kw, width, width), np.float32)
    for kx in range(kw):
        for wo in range(width):
            wi = wo + kx - (kw // 2)
            if 0 <= wi < width:
                sel[kx, wi, wo] = 1.0
    a = jnp.einsum("ykio,kab->yaibo", w_hwio, jnp.asarray(sel))
    return a.reshape(kh, width * cin, width * cout)


def bottleneck_forward(x_nhwc, params, shortcut=True):
    """x_nhwc: (N, H, W, C1) float32.  Returns (N, H, W, C2) float32."""
    w1, b1, w2, b2 = params
    N, H, W, C1 = x_nhwc.shape
    Cm = w1.shape[3]
    C2 = w2.shape[3]
    if shortcut and C1 != C2:
        raise ValueError(f"shortcut residual requires c1 == c2, got {C1} vs {C2}")
    assert w1.shape[2] == C1 and w2.shape[2] == Cm

    # One-time parameter folding: banded bf16 weights + W-tiled f32 biases.
    a1 = _band_weights(w1, W).astype(jnp.bfloat16)          # (3, W*C1, W*Cm)
    a2 = _band_weights(w2, W).astype(jnp.bfloat16)          # (3, W*Cm, W*C2)
    b1r = jnp.tile(b1, W).reshape(1, W * Cm).astype(jnp.float32)
    b2r = jnp.tile(b2, W).reshape(1, W * C2).astype(jnp.float32)

    # Fuse W and C into the minor (lane) axis; contiguous reshape -> free.
    xf = x_nhwc.reshape(N, H, W * C1)

    kernel = functools.partial(_bottleneck_kernel, shortcut=shortcut)
    outf = pl.pallas_call(
        kernel,
        out_shape=jax.ShapeDtypeStruct((N, H, W * C2), x_nhwc.dtype),
        grid=(N,),
        in_specs=[
            pl.BlockSpec((1, H, W * C1), lambda n: (n, 0, 0)),        # x block
            pl.BlockSpec((3, W * C1, W * Cm), lambda n: (0, 0, 0)),   # A1 (resident)
            pl.BlockSpec((1, W * Cm), lambda n: (0, 0)),              # b1
            pl.BlockSpec((3, W * Cm, W * C2), lambda n: (0, 0, 0)),   # A2 (resident)
            pl.BlockSpec((1, W * C2), lambda n: (0, 0)),              # b2
        ],
        out_specs=pl.BlockSpec((1, H, W * C2), lambda n: (n, 0, 0)),
        compiler_params=pltpu.CompilerParams(
            dimension_semantics=("parallel",),        # batch axis -> 2 TCs on v7x
            vmem_limit_bytes=32 * 1024 * 1024,        # safe on v5e/v6e/v7x; usage ~120 KiB
        ),
    )(xf, a1, b1r, a2, b2r)
    return outf.reshape(N, H, W, C2)


# ---------------------------------------------------------------------------
# Synthetic parameters (Conv + eval-mode BN folded) and pure-JAX reference
# ---------------------------------------------------------------------------
def make_params(key, c1, c2, e=1.0, eps=1e-5):
    cm = int(c2 * e)
    ks = jax.random.split(key, 12)

    def conv_bn_fold(kw, kb, kg, kbt, kmu, kvar, cin, cout):
        w = 0.1 * jax.random.normal(kw, (3, 3, cin, cout), jnp.float32)   # HWIO
        b = 0.1 * jax.random.normal(kb, (cout,), jnp.float32)             # conv bias
        gamma = 1.0 + 0.1 * jax.random.normal(kg, (cout,), jnp.float32)
        beta = 0.1 * jax.random.normal(kbt, (cout,), jnp.float32)
        mean = 0.1 * jax.random.normal(kmu, (cout,), jnp.float32)
        var = jax.nn.softplus(jax.random.normal(kvar, (cout,), jnp.float32)) + 0.5
        scale = gamma / jnp.sqrt(var + eps)
        return w * scale.reshape(1, 1, 1, cout), (b - mean) * scale + beta

    w1, b1 = conv_bn_fold(*ks[0:6], c1, cm)
    w2, b2 = conv_bn_fold(*ks[6:12], cm, c2)
    return w1, b1, w2, b2


def reference_forward(x_nhwc, params, operand_dtype=None):
    """Pure-JAX reference.  operand_dtype=bf16 mimics the kernel's MXU precision."""
    w1, b1, w2, b2 = params

    def q(t):
        return t if operand_dtype is None else t.astype(operand_dtype).astype(jnp.float32)

    def conv_relu(x, w, b):
        y = jax.lax.conv_general_dilated(
            q(x), q(w), window_strides=(1, 1), padding=((1, 1), (1, 1)),
            dimension_numbers=("NHWC", "HWIO", "NHWC"),
            preferred_element_type=jnp.float32,
            precision=jax.lax.Precision.HIGHEST)
        return jnp.maximum(y + b.reshape(1, 1, 1, -1), 0.0)

    return x_nhwc + conv_relu(conv_relu(x_nhwc, w1, b1), w2, b2)


if __name__ == "__main__":
    key = jax.random.PRNGKey(0)
    kx, kp = jax.random.split(key)

    # Bottleneck(c1=4, c2=4, shortcut=True, e=1.0); NHWC == NCHW [2, 4, 16, 16]
    N, H, W, C = 2, 16, 16, 4
    x = jax.random.normal(kx, (N, H, W, C), jnp.float32)
    params = make_params(kp, c1=C, c2=C, e=1.0)

    out = jax.block_until_ready(bottleneck_forward(x, params, shortcut=True))

    # Tight check against a reference run at the kernel's bf16 operand precision
    # (catches algorithmic / layout / halo bugs sharply).
    ref_bf16 = reference_forward(x, params, operand_dtype=jnp.bfloat16)
    np.testing.assert_allclose(np.asarray(out), np.asarray(ref_bf16),
                               rtol=1e-2, atol=1e-2)

    # End-to-end check against the full-f32 reference; tolerance loosened for
    # bf16 MXU operands (f32 accumulation).
    ref_f32 = reference_forward(x, params)
    np.testing.assert_allclose(np.asarray(out), np.asarray(ref_f32),
                               rtol=5e-2, atol=5e-2)

    print("KERNEL_OK")
</pallas_src>

<mosaic_0001>
module attributes {stable_mosaic.version = 11 : i64} {
  func.func @_bottleneck_kernel(%arg0: i32, %arg1: memref<1x16x64xf32, #tpu.memory_space<vmem>>, %arg2: memref<3x64x64xbf16, #tpu.memory_space<vmem>>, %arg3: memref<1x64xf32, #tpu.memory_space<vmem>>, %arg4: memref<3x64x64xbf16, #tpu.memory_space<vmem>>, %arg5: memref<1x64xf32, #tpu.memory_space<vmem>>, %arg6: memref<1x16x64xf32, #tpu.memory_space<vmem>>) attributes {dimension_semantics = [#tpu.dimension_semantics<parallel>], iteration_bounds = array<i64: 2>, scalar_prefetch = 0 : i64, scratch_operands = 0 : i64, tpu.core_type = #tpu.core_type<tc>, window_params = [{transform_indices = @transform_0, window_bounds = array<i64: 1, 16, 64>}, {pipeline_mode = #tpu.pipeline_mode<synchronous>, transform_indices = @transform_1, window_bounds = array<i64: 3, 64, 64>}, {pipeline_mode = #tpu.pipeline_mode<synchronous>, transform_indices = @transform_2, window_bounds = array<i64: 1, 64>}, {pipeline_mode = #tpu.pipeline_mode<synchronous>, transform_indices = @transform_3, window_bounds = array<i64: 3, 64, 64>}, {pipeline_mode = #tpu.pipeline_mode<synchronous>, transform_indices = @transform_4, window_bounds = array<i64: 1, 64>}, {transform_indices = @transform_5, window_bounds = array<i64: 1, 16, 64>}]} {
    %c0 = arith.constant 0 : index
    %c0_0 = arith.constant 0 : index
    %c0_1 = arith.constant 0 : index
    %0 = vector.load %arg1[%c0, %c0_0, %c0_1] : memref<1x16x64xf32, #tpu.memory_space<vmem>>, vector<1x16x64xf32>
    %1 = vector.shape_cast %0 : vector<1x16x64xf32> to vector<16x64xf32>
    %cst = arith.constant 0.000000e+00 : f32
    %2 = vector.broadcast %cst : f32 to vector<1x64xf32>
    %3 = vector.extract_strided_slice %1 {offsets = [0, 0], sizes = [15, 64], strides = [1, 1]} : vector<16x64xf32> to vector<15x64xf32>
    %4 = tpu.concatenate %2, %3 in 0 : vector<1x64xf32>, vector<15x64xf32> -> vector<16x64xf32>
    %5 = vector.extract_strided_slice %1 {offsets = [1, 0], sizes = [15, 64], strides = [1, 1]} : vector<16x64xf32> to vector<15x64xf32>
    %6 = tpu.concatenate %5, %2 in 0 : vector<15x64xf32>, vector<1x64xf32> -> vector<16x64xf32>
    %7 = arith.truncf %4 : vector<16x64xf32> to vector<16x64xbf16>
    %c0_2 = arith.constant 0 : index
    %c0_3 = arith.constant 0 : index
    %c0_4 = arith.constant 0 : index
    %8 = vector.load %arg2[%c0_2, %c0_3, %c0_4] : memref<3x64x64xbf16, #tpu.memory_space<vmem>>, vector<1x64x64xbf16>
    %9 = vector.shape_cast %8 : vector<1x64x64xbf16> to vector<64x64xbf16>
    %cst_5 = arith.constant dense<0.000000e+00> : vector<16x64xf32>
    %10 = tpu.matmul %7, %9, %cst_5 {dimension_numbers = #tpu.dot_dimension_numbers<[1], [0], [0], [1], [0, 0, 1, 1], [], []>} : vector<16x64xbf16>, vector<64x64xbf16>, vector<16x64xf32> -> vector<16x64xf32>
    %11 = arith.truncf %1 : vector<16x64xf32> to vector<16x64xbf16>
    %c1 = arith.constant 1 : index
    %c0_6 = arith.constant 0 : index
    %c0_7 = arith.constant 0 : index
    %12 = vector.load %arg2[%c1, %c0_6, %c0_7] : memref<3x64x64xbf16, #tpu.memory_space<vmem>>, vector<1x64x64xbf16>
    %13 = vector.shape_cast %12 : vector<1x64x64xbf16> to vector<64x64xbf16>
    %cst_8 = arith.constant dense<0.000000e+00> : vector<16x64xf32>
    %14 = tpu.matmul %11, %13, %cst_8 {dimension_numbers = #tpu.dot_dimension_numbers<[1], [0], [0], [1], [0, 0, 1, 1], [], []>} : vector<16x64xbf16>, vector<64x64xbf16>, vector<16x64xf32> -> vector<16x64xf32>
    %15 = arith.addf %10, %14 : vector<16x64xf32>
    %16 = arith.truncf %6 : vector<16x64xf32> to vector<16x64xbf16>
    %c2 = arith.constant 2 : index
    %c0_9 = arith.constant 0 : index
    %c0_10 = arith.constant 0 : index
    %17 = vector.load %arg2[%c2, %c0_9, %c0_10] : memref<3x64x64xbf16, #tpu.memory_space<vmem>>, vector<1x64x64xbf16>
    %18 = vector.shape_cast %17 : vector<1x64x64xbf16> to vector<64x64xbf16>
    %cst_11 = arith.constant dense<0.000000e+00> : vector<16x64xf32>
    %19 = tpu.matmul %16, %18, %cst_11 {dimension_numbers = #tpu.dot_dimension_numbers<[1], [0], [0], [1], [0, 0, 1, 1], [], []>} : vector<16x64xbf16>, vector<64x64xbf16>, vector<16x64xf32> -> vector<16x64xf32>
    %20 = arith.addf %15, %19 : vector<16x64xf32>
    %c0_12 = arith.constant 0 : index
    %c0_13 = arith.constant 0 : index
    %21 = vector.load %arg3[%c0_12, %c0_13] : memref<1x64xf32, #tpu.memory_space<vmem>>, vector<1x64xf32>
    %22 = vector.broadcast %21 : vector<1x64xf32> to vector<16x64xf32>
    %23 = arith.addf %20, %22 : vector<16x64xf32>
    %cst_14 = arith.constant 0.000000e+00 : f32
    %24 = vector.broadcast %cst_14 : f32 to vector<16x64xf32>
    %25 = arith.maximumf %23, %24 : vector<16x64xf32>
    %cst_15 = arith.constant 0.000000e+00 : f32
    %26 = vector.broadcast %cst_15 : f32 to vector<1x64xf32>
    %27 = vector.extract_strided_slice %25 {offsets = [0, 0], sizes = [15, 64], strides = [1, 1]} : vector<16x64xf32> to vector<15x64xf32>
    %28 = tpu.concatenate %26, %27 in 0 : vector<1x64xf32>, vector<15x64xf32> -> vector<16x64xf32>
    %29 = vector.extract_strided_slice %25 {offsets = [1, 0], sizes = [15, 64], strides = [1, 1]} : vector<16x64xf32> to vector<15x64xf32>
    %30 = tpu.concatenate %29, %26 in 0 : vector<15x64xf32>, vector<1x64xf32> -> vector<16x64xf32>
    %31 = arith.truncf %28 : vector<16x64xf32> to vector<16x64xbf16>
    %c0_16 = arith.constant 0 : index
    %c0_17 = arith.constant 0 : index
    %c0_18 = arith.constant 0 : index
    %32 = vector.load %arg4[%c0_16, %c0_17, %c0_18] : memref<3x64x64xbf16, #tpu.memory_space<vmem>>, vector<1x64x64xbf16>
    %33 = vector.shape_cast %32 : vector<1x64x64xbf16> to vector<64x64xbf16>
    %cst_19 = arith.constant dense<0.000000e+00> : vector<16x64xf32>
    %34 = tpu.matmul %31, %33, %cst_19 {dimension_numbers = #tpu.dot_dimension_numbers<[1], [0], [0], [1], [0, 0, 1, 1], [], []>} : vector<16x64xbf16>, vector<64x64xbf16>, vector<16x64xf32> -> vector<16x64xf32>
    %35 = arith.truncf %25 : vector<16x64xf32> to vector<16x64xbf16>
    %c1_20 = arith.constant 1 : index
    %c0_21 = arith.constant 0 : index
    %c0_22 = arith.constant 0 : index
    %36 = vector.load %arg4[%c1_20, %c0_21, %c0_22] : memref<3x64x64xbf16, #tpu.memory_space<vmem>>, vector<1x64x64xbf16>
    %37 = vector.shape_cast %36 : vector<1x64x64xbf16> to vector<64x64xbf16>
    %cst_23 = arith.constant dense<0.000000e+00> : vector<16x64xf32>
    %38 = tpu.matmul %35, %37, %cst_23 {dimension_numbers = #tpu.dot_dimension_numbers<[1], [0], [0], [1], [0, 0, 1, 1], [], []>} : vector<16x64xbf16>, vector<64x64xbf16>, vector<16x64xf32> -> vector<16x64xf32>
    %39 = arith.addf %34, %38 : vector<16x64xf32>
    %40 = arith.truncf %30 : vector<16x64xf32> to vector<16x64xbf16>
    %c2_24 = arith.constant 2 : index
    %c0_25 = arith.constant 0 : index
    %c0_26 = arith.constant 0 : index
    %41 = vector.load %arg4[%c2_24, %c0_25, %c0_26] : memref<3x64x64xbf16, #tpu.memory_space<vmem>>, vector<1x64x64xbf16>
    %42 = vector.shape_cast %41 : vector<1x64x64xbf16> to vector<64x64xbf16>
    %cst_27 = arith.constant dense<0.000000e+00> : vector<16x64xf32>
    %43 = tpu.matmul %40, %42, %cst_27 {dimension_numbers = #tpu.dot_dimension_numbers<[1], [0], [0], [1], [0, 0, 1, 1], [], []>} : vector<16x64xbf16>, vector<64x64xbf16>, vector<16x64xf32> -> vector<16x64xf32>
    %44 = arith.addf %39, %43 : vector<16x64xf32>
    %c0_28 = arith.constant 0 : index
    %c0_29 = arith.constant 0 : index
    %45 = vector.load %arg5[%c0_28, %c0_29] : memref<1x64xf32, #tpu.memory_space<vmem>>, vector<1x64xf32>
    %46 = vector.broadcast %45 : vector<1x64xf32> to vector<16x64xf32>
    %47 = arith.addf %44, %46 : vector<16x64xf32>
    %cst_30 = arith.constant 0.000000e+00 : f32
    %48 = vector.broadcast %cst_30 : f32 to vector<16x64xf32>
    %49 = arith.maximumf %47, %48 : vector<16x64xf32>
    %50 = arith.addf %1, %49 : vector<16x64xf32>
    %c0_31 = arith.constant 0 : index
    %c0_32 = arith.constant 0 : index
    %c0_33 = arith.constant 0 : index
    %51 = vector.load %arg6[%c0_31, %c0_32, %c0_33] : memref<1x16x64xf32, #tpu.memory_space<vmem>>, vector<1x16x64xf32>
    %52 = vector.shape_cast %51 : vector<1x16x64xf32> to vector<16x64xf32>
    %53 = vector.shape_cast %50 : vector<16x64xf32> to vector<1x16x64xf32>
    tpu.vector_store %arg6[%c0_31, %c0_32, %c0_33], %53 {strides = array<i32>} : memref<1x16x64xf32, #tpu.memory_space<vmem>>, vector<1x16x64xf32>,
    return
  }
  func.func @transform_0(%arg0: i32) -> (i32, i32, i32) {
    %c0_i32 = arith.constant 0 : i32
    %c0_i32_0 = arith.constant 0 : i32
    %c0_i32_1 = arith.constant 0 : i32
    return %arg0, %c0_i32, %c0_i32_0 : i32, i32, i32
  }
  func.func @transform_1(%arg0: i32) -> (i32, i32, i32) {
    %c0_i32 = arith.constant 0 : i32
    %c0_i32_0 = arith.constant 0 : i32
    %c0_i32_1 = arith.constant 0 : i32
    %c0_i32_2 = arith.constant 0 : i32
    return %c0_i32, %c0_i32_0, %c0_i32_1 : i32, i32, i32
  }
  func.func @transform_2(%arg0: i32) -> (i32, i32) {
    %c0_i32 = arith.constant 0 : i32
    %c0_i32_0 = arith.constant 0 : i32
    %c0_i32_1 = arith.constant 0 : i32
    return %c0_i32, %c0_i32_0 : i32, i32
  }
  func.func @transform_3(%arg0: i32) -> (i32, i32, i32) {
    %c0_i32 = arith.constant 0 : i32
    %c0_i32_0 = arith.constant 0 : i32
    %c0_i32_1 = arith.constant 0 : i32
    %c0_i32_2 = arith.constant 0 : i32
    return %c0_i32, %c0_i32_0, %c0_i32_1 : i32, i32, i32
  }
  func.func @transform_4(%arg0: i32) -> (i32, i32) {
    %c0_i32 = arith.constant 0 : i32
    %c0_i32_0 = arith.constant 0 : i32
    %c0_i32_1 = arith.constant 0 : i32
    return %c0_i32, %c0_i32_0 : i32, i32
  }
  func.func @transform_5(%arg0: i32) -> (i32, i32, i32) {
    %c0_i32 = arith.constant 0 : i32
    %c0_i32_0 = arith.constant 0 : i32
    %c0_i32_1 = arith.constant 0 : i32
    return %arg0, %c0_i32, %c0_i32_0 : i32, i32, i32
  }
}

</mosaic_0001>

<bundles_post_ra>
// kernel: tpu_custom_call.1
= control target key start
LH: loop header
LB: loop body
LE: loop exit
PB: predicated region body
PF: predicated region fallthrough
CT: control target
= control target key end

     0   :  { %10 = vsyncpa [#allocation3], 0  ;;  %s1348_s0 = inlined_call_operand.hbm [shape: f32[2,16,64], index: 0, kind: input, shape index: {}]   ;;  %s1349_s1 = inlined_call_operand.hbm [shape: bf16[3,64,64], index: 1, kind: input, shape index: {}]   ;;  %s1350_s2 = inlined_call_operand.vmem [shape: f32[1,64], index: 2, kind: input, shape index: {}]   ;;  %s1351_s3 = inlined_call_operand.hbm [shape: bf16[3,64,64], index: 3, kind: input, shape index: {}]   ;;  %s1352_s4 = inlined_call_operand.vmem [shape: f32[1,64], index: 4, kind: input, shape index: {}]   ;;  %s1353_s5 = inlined_call_operand.hbm [shape: f32[2,16,64], index: 5, kind: output, shape index: {}]  }
   0x1   :  { %12 = vsyncpa [#allocation3 + $0x1], 0 }
   0x2   :  { %13 = vsyncpa [#allocation6], 0 }
   0x3   :  { %14 = vsyncpa [#allocation4], 0 }
   0x4   :  { %16 = vsyncpa [#allocation4 + $0x1], 0  ;;  %s1169_s18 = smov 0   ;;  %s1171_s19 = smov 0  }
   0x5   :  { %s1173_s20 = smov 0   ;;  %s1175_s21 = smov 0  }
   0x6 LB: > { %s1190_s22 = sadd.s32 4294967295, %s1129_s21   ;;  %s748_s23 = sadd.s32 4294967294, %s1129_s21   ;;  %s1129_s21 = sphi %s1175_s21, %s1363_s21   ;;  %s1125_s20 = sphi %s1173_s20, %s1362_s20   ;;  %s1121_s19 = sphi %s1171_s19, %s1361_s19   ;;  %s1117_s18 = sphi %s1169_s18, %s1360_s18  }
   0x7   : > { %p42_p0 = scmp.ne.s32.totalorder %s1121_s19, %s1117_s18  ;;  %p43_p1 = scmp.eq.s32.totalorder %s1190_s22, 0 }
   0x8   : > { %p150_p2 = scmp.eq.s32.totalorder %s1190_s22, 1  ;;  %p156_p3 = scmp.eq.s32.totalorder %s748_s23, 1 }
   0x9   : > { %p1199_p4 = por %p43_p1, %p42_p0  ;;  %p749_p5 = scmp.ge.s32.totalorder %s1129_s21, 1 }
   0xa   : > { %p1204_p6 = por %p156_p3, %p42_p0  ;;  %p163_p7 = scmp.lt.s32.totalorder %s1129_s21, 3 }
   0xb   : > { %s174_s28 = sshll.u32 %s1349_s1, 4  ;;  %s1131_s30 = smov [#allocation5]   ;;  %s175_s28 = int_to_ptr.hbm [resolvable:$true] %s174_s28 }
   0xc   : > { %p1212_p8 = pnand %p749_p5, %p163_p7  ;;  %s176_s6 = sshll.u32 %s1131_s30, 4  ;;  %s177_s6 = int_to_ptr.vmem [resolvable:$true] %s176_s6 }
   0xd   : > { %s191_s9 = sshll.u32 %s1351_s3, 4  ;;  %s1132_s10 = smov 64   ;;  %s192_s9 = int_to_ptr.hbm [resolvable:$true] %s191_s9 }
   0xe   : > { %p906_p9 = pneg %p1212_p8  ;;  %s1133_s11 = smov 4  }
   0xf   : > { %s1134_s12 = smov [#allocation7]   ;;  %s1225_s14 = sadd.s32 1, %s1129_s21  }
  0x10   : > { %p907_p10 = pnand %p906_p9, %p43_p1  ;;  %s193_s13 = sshll.u32 %s1134_s12, 4  ;;  %s194_s13 = int_to_ptr.vmem [resolvable:$true] %s193_s13 }
  0x11   : > { %s29_s15 = sadd.s32 1, %s1125_s20  ;;  %s26_s16 = ssub.s32 %s1129_s21, %s1225_s14 }
  0x12   : > { %909 = dma.hbm_to_vmem [thread:$0]  (!%p907_p10), %s175_s28, 1536, %s177_s6, [#allocation6], %s1132_s10, %s1132_s10, %s1133_s11  }
  0x13   : > { %912 = dma.hbm_to_vmem [thread:$0]  (!%p907_p10), %s192_s9, 1536, %s194_s13, [#allocation6], %s1132_s10, %s1132_s10, %s1133_s11  }
  0x14   : > { %p36_p12 = scmp.ne.s32.totalorder %s1125_s20, %s1121_s19  ;;  %p27_p13 = scmp.eq.s32.totalorder %s26_s16, 0 }
  0x15   : > { %p37_p0 = scmp.eq.s32.totalorder %s1129_s21, 0  ;;  %p923_p5 = scmp.lt.s32.totalorder %s1129_s21, 2 }
  0x16   : > { %p1235_p3 = por %p150_p2, %p36_p12  ;;  %s210_s26 = sand.u32 1, %s1125_s20  }
  0x17   : > { %s1241_s23 = scalar_select %p27_p13, %s1125_s20, %s29_s15  }
  0x18   : > { %p38_p7 = por %p37_p0, %p36_p12  ;;  %s753_s27 = sshll.u32 %s210_s26, 4 }
  0x19   : > { %s868_s28 = sshll.u32 %s1129_s21, 4  ;;  %s214_s8 = scalar_lea.vmem [#allocation2], %s753_s27 }
  0x1a   : > { %s219_s7 = scalar_lea.hbm %s1348_s0, %s868_s28  ;;  %s222_s9 = sshll.u32 %s214_s8, 4  ;;  %s223_s9 = int_to_ptr.vmem [resolvable:$true] %s222_s9 }
  0x1b   : > { %s220_s10 = sshll.u32 %s219_s7, 4  ;;  %p1248_p2 = pnand %p923_p5, %p38_p7  ;;  %s221_s10 = int_to_ptr.hbm [resolvable:$true] %s220_s10 }
  0x1c   : > { %s211_s12 = scalar_lea.sflag [#allocation3], %s210_s26  ;;  %s1029_s13 = sshra.s32 %s221_s10, 4  ;;  %s1030_s13 = int_to_ptr.hbm [resolvable:$true] %s1029_s13 }
  0x1d   : > { %s1031_s15 = scalar_lea.hbm %s1030_s13, 16  ;;  %p1033_p10 = pneg %p1248_p2 }
  0x1e   : > { %p1032_p9 = scmp.ne.s32.totalorder %s1030_s13, %s1031_s15  ;;  %s1036_s28 = scalar_lea.hbm %s1348_s0, 32 }
  0x1f   : > { %p1037_p0 = scmp.lt.s32.totalorder %s1030_s13, %s1348_s0  ;;  %p1038_p5 = scmp.lt.s32.totalorder %s1036_s28, %s1031_s15 }
  0x20   : > { %p1034_p12 = pnand %p1033_p10, %p1032_p9 }
  0x21   : > { %p1039_p7 = por %p1038_p5, %p1037_p0 }
  0x22   : > { %p1035_p13 = pneg %p1034_p12 }
  0x24   : > { %p1040_p11 = pnand %p1039_p7, %p1035_p13 }
  0x26   : > { %1043 = shalt.err (!%p1040_p11)
}
  0x27   : > { %s1135_s26 = smov 128   ;;  %s1136_s7 = smov 8  }
  0x28   : > { %916 = dma.hbm_to_vmem [thread:$0]  (!%p1248_p2), %s221_s10, 256, %s223_s9, %s211_s12, %s1135_s26, %s1135_s26, %s1136_s7  }
  0x29   : > { %234 = sbr.rel (%p1212_p8) target bundleno = 369 (0x171), region = 40  ;;  %s1265_s8 = sand.u32 (!%p1212_p8), 1, %s1121_s19  }
  0x2a   : > { %s757_s13 = sshll.u32 (!%p1212_p8), %s1265_s8, 4  ;;  %s237_s15 = scalar_lea.sflag (!%p1212_p8), [#allocation3], %s1265_s8 }
  0x2b   : > { %s240_s16 = scalar_lea.vmem (!%p1212_p8), [#allocation2], %s757_s13 }
  0x2e   : > { %1104 = dma.done.wait (%p1199_p4), %s237_s15, 256  }
  0x2f   : > { %1106 = vsyncadd (%p1199_p4), %s237_s15, 4294967040 }
  0x30   : > { %1108 = dma.done.wait (%p43_p1), [#allocation6], 3072  }
  0x31   : > { %1110 = vsyncadd (%p43_p1), [#allocation6], 4294964224  ;;  %v876_v0 = vld [vmem:[#allocation5 + $0x38] sm:$0xff]  ;;  %v875_v3 = vld [vmem:[#allocation5 + $0x30] sm:$0xff]  ;;  %vm283_vm0 = vcmask 1040384   ;;  %vm290_vm1 = vcmask 1046528  }
  0x32   : > { %v872_v1 = vld [vmem:[#allocation5 + $0x18] sm:$0xff]  ;;  %348 = vmatpush.bf16.msra.mxu0 %v876_v0  ;;  %v871_v4 = vld [vmem:[#allocation5 + $0x10] sm:$0xff]  ;;  %v874_v8 = vld [vmem:[#allocation5 + $0x28] sm:$0xff]  ;;  %vm340_vm2 = vcmask 523264   ;;  %s893_s11 = sshll.u32 %s1190_s22, 4  ;;  %s277_s30 = scalar_lea.vmem [#allocation8], %s757_s13 }
  0x33   : > { %v880_v2 = vld [vmem:[#allocation5 + $0x58] sm:$0xff]  ;;  %389 = vmatpush.bf16.msra.mxu1 %v872_v1  ;;  %v879_v5 = vld [vmem:[#allocation5 + $0x50] sm:$0xff]  ;;  %v870_v9 = vld [vmem:[#allocation5 + $0x8] sm:$0xff]  ;;  %s652_s28 = scalar_lea.hbm %s1353_s5, %s893_s11  ;;  %s653_s6 = sshll.u32 %s277_s30, 4  ;;  %s654_s6 = int_to_ptr.vmem [resolvable:$true] %s653_s6 }
  0x34   : > { %440 = vmatpush.bf16.msra.mxu2 %v880_v2  ;;  %v1279_v6 = vld [vmem:[%s240_s16] sm:$0xff]  ;;  %v1281_v7 = vld [vmem:[%s240_s16 + $0x8] sm:$0xff]  ;;  %s655_s22 = sshll.u32 %s652_s28, 4  ;;  %s641_s26 = scalar_lea.sflag [#allocation4], %s1265_s8  ;;  %s656_s22 = int_to_ptr.hbm [resolvable:$true] %s655_s22 }
  0x35   : > { %v284_v10 = vrot.slane %v1279_v6, 7  ;;  %v285_v11 = vrot.slane %v1281_v7, 7  ;;  %v878_v12 = vld [vmem:[#allocation5 + $0x48] sm:$0xff]  ;;  %v291_v13 = vrot.slane %v1279_v6, 1  ;;  %v292_v14 = vrot.slane %v1281_v7, 1  ;;  %v873_v15 = vld [vmem:[#allocation5 + $0x20] sm:$0xff] }
  0x36   : > { %349 = vmatpush.bf16.msra.mxu0 %v875_v3  ;;  %v869_v16 = vld [vmem:[#allocation5] sm:$0xff]  ;;  %v306_v22 = vpack.c.bf16 %v1281_v7, %v1279_v6  ;;  %v888_v25 = vld [vmem:[#allocation7 + $0x38] sm:$0xff]  ;;  %v887_v28 = vld [vmem:[#allocation7 + $0x30] sm:$0xff]  ;;  %s1073_s7 = sshra.s32 %s656_s22, 4  ;;  %s1079_s24 = scalar_lea.hbm %s1353_s5, 32  ;;  %s1074_s7 = int_to_ptr.hbm [resolvable:$true] %s1073_s7 }
  0x37   : > { %390 = vmatpush.bf16.msra.mxu1 %v871_v4  ;;  %v286_v17 = vsel %vm283_vm0, %v284_v10, %v285_v11  ;;  %v289_v18 = vsel %vm283_vm0, 0.0, %v284_v10  ;;  %v877_v19 = vld [vmem:[#allocation5 + $0x40] sm:$0xff]  ;;  %v293_v20 = vsel %vm290_vm1, %v291_v13, %v292_v14  ;;  %v296_v21 = vsel %vm290_vm1, %v292_v14, 0.0  ;;  %524 = vmatpush.bf16.msra.mxu3 %v888_v25  ;;  %v884_v26 = vld [vmem:[#allocation7 + $0x18] sm:$0xff]  ;;  %v883_v29 = vld [vmem:[#allocation7 + $0x10] sm:$0xff]  ;;  %s1075_s15 = scalar_lea.hbm %s1074_s7, 16  ;;  %p1080_p11 = scmp.lt.s32.totalorder %s1074_s7, %s1353_s5 }
  0x38   : > { %441 = vmatpush.bf16.msra.mxu2 %v879_v5  ;;  %v297_v23 = vpack.c.bf16 %v286_v17, %v289_v18  ;;  %v399_v24 = vpack.c.bf16 %v296_v21, %v293_v20  ;;  %v892_v27 = vld [vmem:[#allocation7 + $0x58] sm:$0xff]  ;;  %v891_v30 = vld [vmem:[#allocation7 + $0x50] sm:$0xff]  ;;  %v886_v31 = vld [vmem:[#allocation7 + $0x28] sm:$0xff]  ;;  %p1076_p1 = scmp.ne.s32.totalorder %s1074_s7, %s1075_s15  ;;  %p1081_p2 = scmp.lt.s32.totalorder %s1079_s24, %s1075_s15 }
  0x39   : > { %v882_v32 = vld [vmem:[#allocation7 + $0x8] sm:$0xff]  ;;  %v885_v34 = vld [vmem:[#allocation7 + $0x20] sm:$0xff] }
  0x3a   : > { %350 = vmatpush.bf16.msra.mxu0 %v874_v8  ;;  %v890_v33 = vld [vmem:[#allocation7 + $0x48] sm:$0xff]  ;;  %v881_v35 = vld [vmem:[#allocation7] sm:$0xff]  ;;  %p1077_p4 = pnand %p1076_p1, %p1235_p3  ;;  %p1082_p9 = por %p1081_p2, %p1080_p11 }
  0x3b   : > { %391 = vmatpush.bf16.msra.mxu1 %v870_v9  ;;  %525 = vmatpush.bf16.msra.mxu3 %v887_v28  ;;  %v889_v36 = vld [vmem:[#allocation7 + $0x40] sm:$0xff] }
  0x3c   : > { %442 = vmatpush.bf16.msra.mxu2 %v878_v12  ;;  %v967_v42 = vld [vmem:[%s1350_s2] ss:$0 sm:$0xff]  ;;  %p1078_p8 = pneg %p1077_p4 }
  0x3d   : > { %v968_v3 = vld [vmem:[%s1352_s4] ss:$0 sm:$0xff] }
  0x3e   : > { %351 = vmatpush.bf16.msra.mxu0 %v873_v15  ;;  %p1083_p10 = pnand %p1082_p9, %p1078_p8 }
  0x3f   : > { %392 = vmatpush.bf16.msra.mxu1 %v869_v16  ;;  %526 = vmatpush.bf16.msra.mxu3 %v886_v31 }
  0x40   : > { %443 = vmatpush.bf16.msra.mxu2 %v877_v19 }
  0x41   : > { %777 = vmatmul.msk.bf16.vlgmr.msra.gmra.mxu0 %vm340_vm2, %v306_v22 }
  0x42   : > { %794 = vmatmul.msk.bf16.vlgmr.msra.gmra.mxu1 %vm340_vm2, %v297_v23  ;;  %565 = vmatpush.bf16.msrb.mxu0 %v884_v26 }
  0x43   : > { %811 = vmatmul.msk.bf16.vlgmr.msra.gmra.mxu2 %vm340_vm2, %v399_v24  ;;  %616 = vmatpush.bf16.msrb.mxu1 %v892_v27 }
  0x44   : > { %527 = vmatpush.bf16.msra.mxu3 %v885_v34 }
  0x46   : > { %566 = vmatpush.bf16.msrb.mxu0 %v883_v29 }
  0x47   : > { %617 = vmatpush.bf16.msrb.mxu1 %v891_v30 }
  0x4a   : > { %567 = vmatpush.bf16.msrb.mxu0 %v882_v32 }
  0x4b   : > { %618 = vmatpush.bf16.msrb.mxu1 %v890_v33 }
  0x4e   : > { %568 = vmatpush.bf16.msrb.mxu0 %v881_v35 }
  0x4f   : > { %619 = vmatpush.bf16.msrb.mxu1 %v889_v36 }
  0xbe   : > { %v353_v37 = vpop.f32.mrf.mxu0 }
  0xbf   : > { %v394_v38 = vpop.f32.mrf.mxu1 }
  0xc0   : > { %v395_v39 = vadd.f32 %v394_v38, %v353_v37 }
  0xc6   : > { %v445_v40 = vpop.f32.mrf.mxu2  ;;  %v355_v43 = vpop.f32.mrf.mxu0 }
  0xc7   : > { %v450_v41 = vadd.f32 %v445_v40, %v395_v39  ;;  %v396_v44 = vpop.f32.mrf.mxu1 }
  0xc8   : > { %v397_v46 = vadd.f32 %v396_v44, %v355_v43 }
  0xc9   : > { %v456_v45 = vadd.f32 %v967_v42, %v450_v41 }
  0xcb   : > { %v458_v48 = vmax.f32 %v456_v45, 0.0 }
  0xcd   : > { %v462_v51 = vrot.slane %v458_v48, 7  ;;  %v468_v53 = vrot.slane %v458_v48, 1 }
  0xce   : > { %v447_v47 = vpop.f32.mrf.mxu2 }
  0xcf   : > { %v451_v49 = vadd.f32 %v447_v47, %v397_v46  ;;  %v467_v58 = vsel %vm283_vm0, 0.0, %v462_v51 }
  0xd1   : > { %v457_v50 = vadd.f32 %v967_v42, %v451_v49 }
  0xd3   : > { %v459_v52 = vmax.f32 %v457_v50, 0.0 }
  0xd5   : > { %v463_v54 = vrot.slane %v459_v52, 7  ;;  %v469_v55 = vrot.slane %v459_v52, 1  ;;  %v483_v56 = vpack.c.bf16 %v459_v52, %v458_v48 }
  0xd7   : > { %828 = vmatmul.msk.bf16.vlgmr.msra.gmra.mxu3 %vm340_vm2, %v483_v56  ;;  %v464_v57 = vsel %vm283_vm0, %v462_v51, %v463_v54  ;;  %v470_v59 = vsel %vm290_vm1, %v468_v53, %v469_v55  ;;  %v473_v60 = vsel %vm290_vm1, %v469_v55, 0.0 }
  0xd8   : > { %v474_v61 = vpack.c.bf16 %v464_v57, %v467_v58  ;;  %v575_v62 = vpack.c.bf16 %v473_v60, %v470_v59 }
  0xda   : > { %845 = vmatmul.msk.bf16.vlgmr.msrb.gmra.mxu0 %vm340_vm2, %v474_v61  ;;  %862 = vmatmul.msk.bf16.vlgmr.msrb.gmra.mxu1 %vm340_vm2, %v575_v62 }
 0x157   : > { %v570_v63 = vpop.f32.mrf.mxu0  ;;  %v621_v0 = vpop.f32.mrf.mxu1 }
 0x15a   : > { %v529_v1 = vpop.f32.mrf.mxu3 }
 0x15b   : > { %v571_v2 = vadd.f32 %v570_v63, %v529_v1 }
 0x15d   : > { %v626_v4 = vadd.f32 %v621_v0, %v571_v2 }
 0x15f   : > { %v632_v5 = vadd.f32 %v968_v3, %v626_v4  ;;  %v572_v9 = vpop.f32.mrf.mxu0  ;;  %v623_v13 = vpop.f32.mrf.mxu1 }
 0x161   : > { %v634_v8 = vmax.f32 %v632_v5, 0.0 }
 0x162   : > { %v531_v10 = vpop.f32.mrf.mxu3 }
 0x163   : > { %v636_v11 = vadd.f32 %v634_v8, %v1279_v6  ;;  %v573_v12 = vadd.f32 %v572_v9, %v531_v10 }
 0x165   : > { %638 = vst.msk [vmem:[%s277_s30] sm:$0xff] %vm340_vm2, %v636_v11  ;;  %v627_v14 = vadd.f32 %v623_v13, %v573_v12 }
 0x167   : > { %v633_v15 = vadd.f32 %v968_v3, %v627_v14 }
 0x169   : > { %v635_v16 = vmax.f32 %v633_v15, 0.0 }
 0x16b   : > { %v637_v6 = vadd.f32 %v635_v16, %v1281_v7 }
 0x16d   : > { %639 = vst.msk [vmem:[%s277_s30 + $0x8] sm:$0xff] %vm340_vm2, %v637_v6 }
 0x16e   : > { %1086 = shalt.err (!%p1083_p10)
}
 0x16f   : > { %s1137_s8 = smov 128   ;;  %s1138_s10 = smov 8  }
 0x170   : > { %904 = dma.vmem_to_hbm [thread:$0]  (%p1235_p3), %s654_s6, 256, %s656_s22, %s641_s26, %s1137_s8, %s1137_s8, %s1138_s10  }
 0x171 PF: > { %s670_s11 = sand.u32 1, %s1117_s18   ;;  %p1359_p12 = scmp.ge.s32.totalorder %s1129_s21, 2 }
 0x172   : > { %s671_s12 = scalar_lea.sflag [#allocation4], %s670_s11 }
 0x173   : > { %p918_p13 = pnand %p1359_p12, %p1204_p6 }
 0x175   : > { %p919_p0 = pneg %p918_p13 }
 0x177   : > { %1112 = dma.done.wait (%p919_p0), %s671_s12, 256  }
 0x178   : > { %1114 = vsyncadd (%p919_p0), %s671_s12, 4294967040  ;;  %p19_p5 = scmp.ge.s32.totalorder %s1225_s14, 4   ;;  %s1360_s18 = smov %s1121_s19 }
 0x179   : > { %s1361_s19 = smov %s1125_s20  ;;  %s1362_s20 = smov %s1241_s23 }
 0x17a   : > { %s1363_s21 = smov %s1225_s14  ;;  %21 = sbr.rel (!%p19_p5) target bundleno = 6 (0x6), region = 97 }
 0x17f   :  { %677 = vsyncpa [#allocation3], 1 }
 0x180   :  { %679 = vsyncpa [#allocation3 + $0x1], 1 }
 0x181   :  { %680 = vsyncpa [#allocation6], 1 }
 0x182   :  { %681 = vsyncpa [#allocation4], 1 }
 0x183   :  { %683 = vsyncpa [#allocation4 + $0x1], 1 }

</bundles_post_ra>
